<compile_context>
chip_gen: v7x
topology: tpu7x:2x2x1
jax: 0.10.0
libtpu: 0.0.40
codegen_flags: <defaults>
</compile_context>

<pallas_src>
import jax
import jax.numpy as jnp
from jax.experimental import pallas as pl
from jax.experimental.pallas import tpu as pltpu

_LANES = 128
_SUBLANES = 8
_PAD_LOGIT = -100.0   # sigmoid(-100)~0 and log1p(exp(-100))~0 -> inert with target 0
_SMOOTH = 1e-05


def _vmem_budgets():
    """Returns (raw-input bytes per tile, vmem_limit_bytes); safe on v7x."""
    vmem_limit = 32 * 1024 * 1024                       # conservative fallback
    try:
        cap = int(pltpu.get_tpu_info().vmem_capacity_bytes)
        vmem_limit = max(16 * 1024 * 1024, min(cap // 2, 64 * 1024 * 1024))
    except Exception:
        pass
    # /10 leaves room for double-buffered inputs + the f32 elementwise temps.
    return vmem_limit // 10, vmem_limit


def _make_kernel(n, r, tr, t_per_core, num_blocks, num_cores):
    """Kernel closure over the static tiling parameters."""
    full_blocks = r // tr                       # row-tiles fully inside [0, r)
    needs_mask = (r % tr != 0) or (num_blocks % num_cores != 0)

    def kernel(logits_ref, targets_ref, inter_ref, union_ref, bce_ref):
        tt = pl.program_id(1)

        @pl.when(tt == 0)
        def _init():
            inter_ref[...] = jnp.zeros_like(inter_ref)
            union_ref[...] = jnp.zeros_like(union_ref)
            bce_ref[...] = jnp.zeros_like(bce_ref)

        x = logits_ref[...].astype(jnp.float32)    # (N, TR, 128)
        t = targets_ref[...].astype(jnp.float32)   # (N, TR, 128)

        def accumulate(x, t):
            # One shared exp feeds both the stable sigmoid and the softplus.
            e = jnp.exp(-jnp.abs(x))
            inv = pl.reciprocal(1.0 + e, approx=True)   # EUP, not a VALU divide
            p = jnp.where(x >= 0.0, inv, e * inv)        # sigmoid(x), stable
            bce = jnp.maximum(x, 0.0) - x * t + jnp.log1p(e)

            def fold(v):   # (N, TR, 128) -> (N, 1, 128): lanes stay dense
                return jnp.sum(v, axis=1, keepdims=True)

            inter_ref[...] += fold(p * t)[None]          # (1, N, 1, 128)
            union_ref[...] += fold(p + t)[None]
            bce_ref[...] += fold(bce)[None]

        if not needs_mask:
            accumulate(x, t)
        else:
            idx = pl.program_id(0) * t_per_core + tt     # unclamped block index
            is_full = idx < full_blocks

            @pl.when(is_full)
            def _full_tile():
                accumulate(x, t)

            @pl.when(jnp.logical_not(is_full))
            def _ragged_tile():
                # Ragged last row-tile, or an empty per-core tile that re-read
                # the last block: neutralize invalid rows so they add ~0.
                valid = r - idx * tr
                row = jax.lax.broadcasted_iota(jnp.int32, (1, tr, _LANES), 1)
                keep = row < valid
                accumulate(jnp.where(keep, x, _PAD_LOGIT),
                           jnp.where(keep, t, 0.0))

    return kernel


def bce_dice_loss(logits, targets, *, num_cores=2, block_budget_bytes=None):
    """Pallas implementation of BCEDiceLoss.forward.

    logits:  (N, C, H, W) float (bf16 recommended; f32 also works)
    targets: (N, C, H, W) or (N, H, W) 0/1 masks (bf16 / f32 / int)
    returns: scalar float32 loss
    """
    if targets.ndim == 3:
        targets = targets[:, None, :, :]
    assert logits.shape == targets.shape, (logits.shape, targets.shape)

    n, c, h, w = logits.shape
    d = c * h * w

    logits_2d = logits.reshape(n, d)
    targets_2d = targets.reshape(n, d)

    r = pl.cdiv(d, _LANES)
    if d % _LANES != 0 or r < _SUBLANES:
        # Only non-128-multiple / tiny inputs pay a pad copy; common
        # segmentation shapes (C*H*W % 128 == 0) take the copy-free path.
        # TODO(synk): handle the <128-elem tail in plain JAX to drop this copy.
        r = max(r, _SUBLANES)
        pad = r * _LANES - d
        logits_2d = jnp.pad(logits_2d, ((0, 0), (0, pad)),
                            constant_values=_PAD_LOGIT)
        targets_2d = jnp.pad(targets_2d, ((0, 0), (0, pad)), constant_values=0)
    logits_3d = logits_2d.reshape(n, r, _LANES)      # contiguous -> free
    targets_3d = targets_2d.reshape(n, r, _LANES)

    if block_budget_bytes is None:
        block_budget_bytes, vmem_limit_bytes = _vmem_budgets()
    else:
        vmem_limit_bytes = 32 * 1024 * 1024

    bytes_per_pos = logits_3d.dtype.itemsize + targets_3d.dtype.itemsize

    # Rows per tile: as large as the budget allows, a multiple of 8, and no
    # larger than one core's (rounded-up) share of the rows.
    tr = block_budget_bytes // (n * _LANES * bytes_per_pos)
    tr = max(_SUBLANES, (tr // _SUBLANES) * _SUBLANES)
    rows_per_core = pl.cdiv(pl.cdiv(r, num_cores), _SUBLANES) * _SUBLANES
    tr = min(tr, max(_SUBLANES, rows_per_core))

    num_blocks = pl.cdiv(r, tr)
    t_per_core = pl.cdiv(num_blocks, num_cores)
    last_block = num_blocks - 1

    def in_index_map(cc, tt):
        idx = cc * t_per_core + tt
        if num_cores * t_per_core != num_blocks:
            idx = jnp.minimum(idx, last_block)   # empty tiles re-read last block
        return (0, idx, 0)

    in_spec = pl.BlockSpec((n, tr, _LANES), in_index_map)
    part_spec = pl.BlockSpec((1, n, 1, _LANES), lambda cc, tt: (cc, 0, 0, 0))
    out_sd = jax.ShapeDtypeStruct((num_cores, n, 1, _LANES), jnp.float32)

    total = n * d
    cost = pl.CostEstimate(
        flops=15 * total,                 # elementwise (~12) + fold adds (~3)
        transcendentals=2 * total,        # exp + log1p (recip is approx / EUP)
        bytes_accessed=int(total * bytes_per_pos
                           + 3 * num_cores * n * _LANES * 4),
    )

    kernel = _make_kernel(n, r, tr, t_per_core, num_blocks, num_cores)

    inter_p, union_p, bce_p = pl.pallas_call(
        kernel,
        out_shape=(out_sd, out_sd, out_sd),
        grid_spec=pltpu.PrefetchScalarGridSpec(
            num_scalar_prefetch=0,
            grid=(num_cores, t_per_core),
            in_specs=[in_spec, in_spec],
            out_specs=(part_spec, part_spec, part_spec),
        ),
        compiler_params=pltpu.CompilerParams(
            # The leading axis is intended to shard across v7x's 2 TensorCores;
            # switch to pltpu.CORE_PARALLEL if plain "parallel" does not split.
            dimension_semantics=("parallel", "arbitrary"),
            vmem_limit_bytes=vmem_limit_bytes,
        ),
        cost_estimate=cost,
    )(logits_3d, targets_3d)

    # Tiny finalize in plain JAX: (cores, N, 1, 128) partials -> scalar loss.
    inter = jnp.sum(inter_p, axis=(0, 2, 3))   # (N,)
    union = jnp.sum(union_p, axis=(0, 2, 3))   # (N,)
    bce_sum = jnp.sum(bce_p)                   # scalar

    dice = (2.0 * inter + _SMOOTH) / (union + _SMOOTH)
    dice_loss = 1.0 - jnp.mean(dice)
    bce_loss = bce_sum / jnp.float32(n * d)    # mean over the *unpadded* count
    return bce_loss + dice_loss


def _reference_bce_dice(logits, targets):
    """Plain-JAX reference mirroring the PyTorch module."""
    if targets.ndim == 3:
        targets = targets[:, None, :, :]
    logits = logits.astype(jnp.float32)
    targets = targets.astype(jnp.float32)
    probs = jax.nn.sigmoid(logits)
    smooth = 1e-05
    intersection = jnp.sum(probs * targets, axis=(1, 2, 3))
    union = jnp.sum(probs, axis=(1, 2, 3)) + jnp.sum(targets, axis=(1, 2, 3))
    dice = (2.0 * intersection + smooth) / (union + smooth)
    dice_loss = 1.0 - jnp.mean(dice)
    bce = jnp.mean(jnp.maximum(logits, 0.0) - logits * targets
                   + jnp.log1p(jnp.exp(-jnp.abs(logits))))
    return bce + dice_loss


if __name__ == "__main__":
    key = jax.random.PRNGKey(0)
    k1, k2 = jax.random.split(key)

    # Small segmentation-style shapes: N=2, C=4, H=W=16.
    # Ship BOTH inputs as bf16: 0/1 masks are exact in bf16, and bf16 logits
    # halve HBM traffic (the kernel up-casts each tile to f32 internally).
    logits = jax.random.normal(k1, (2, 4, 16, 16), dtype=jnp.float32)
    logits = logits.astype(jnp.bfloat16)
    targets = (jax.random.uniform(k2, (2, 4, 16, 16)) > 0.5).astype(jnp.bfloat16)

    loss = jax.block_until_ready(bce_dice_loss(logits, targets))
    ref = jax.block_until_ready(_reference_bce_dice(logits, targets))

    # approx reciprocal (EUP) carries ~2^-12 relative error on sigmoid -> dice,
    # so the tolerance is loosened vs the exact reference.
    assert jnp.allclose(loss, ref, rtol=2e-3, atol=2e-3), (loss, ref)
    print("KERNEL_OK")
</pallas_src>

<mosaic_0001>
module attributes {stable_mosaic.version = 11 : i64} {
  func.func @kernel(%arg0: i32, %arg1: i32, %arg2: memref<2x8x128xbf16, #tpu.memory_space<vmem>>, %arg3: memref<2x8x128xbf16, #tpu.memory_space<vmem>>, %arg4: memref<1x2x1x128xf32, #tpu.memory_space<vmem>>, %arg5: memref<1x2x1x128xf32, #tpu.memory_space<vmem>>, %arg6: memref<1x2x1x128xf32, #tpu.memory_space<vmem>>) attributes {dimension_semantics = [#tpu.dimension_semantics<parallel>, #tpu.dimension_semantics<arbitrary>], iteration_bounds = array<i64: 2, 1>, scalar_prefetch = 0 : i64, scratch_operands = 0 : i64, tpu.core_type = #tpu.core_type<tc>, window_params = [{transform_indices = @transform_0, window_bounds = array<i64: 2, 8, 128>}, {transform_indices = @transform_1, window_bounds = array<i64: 2, 8, 128>}, {transform_indices = @transform_2, window_bounds = array<i64: 1, 2, 1, 128>}, {transform_indices = @transform_3, window_bounds = array<i64: 1, 2, 1, 128>}, {transform_indices = @transform_4, window_bounds = array<i64: 1, 2, 1, 128>}]} {
    %c0_i32 = arith.constant 0 : i32
    %0 = arith.cmpi eq, %arg1, %c0_i32 : i32
    %1 = arith.extui %0 : i1 to i32
    %c0_i32_0 = arith.constant 0 : i32
    %2 = arith.cmpi ne, %1, %c0_i32_0 : i32
    scf.if %2 {
      %cst = arith.constant 0.000000e+00 : f32
      %15 = vector.broadcast %cst : f32 to vector<1x2x1x128xf32>
      %c0_9 = arith.constant 0 : index
      %c0_10 = arith.constant 0 : index
      %c0_11 = arith.constant 0 : index
      %c0_12 = arith.constant 0 : index
      %16 = vector.load %arg4[%c0_9, %c0_10, %c0_11, %c0_12] : memref<1x2x1x128xf32, #tpu.memory_space<vmem>>, vector<1x2x1x128xf32>
      tpu.vector_store %arg4[%c0_9, %c0_10, %c0_11, %c0_12], %15 {strides = array<i32>} : memref<1x2x1x128xf32, #tpu.memory_space<vmem>>, vector<1x2x1x128xf32>,
      %cst_13 = arith.constant 0.000000e+00 : f32
      %17 = vector.broadcast %cst_13 : f32 to vector<1x2x1x128xf32>
      %c0_14 = arith.constant 0 : index
      %c0_15 = arith.constant 0 : index
      %c0_16 = arith.constant 0 : index
      %c0_17 = arith.constant 0 : index
      %18 = vector.load %arg5[%c0_14, %c0_15, %c0_16, %c0_17] : memref<1x2x1x128xf32, #tpu.memory_space<vmem>>, vector<1x2x1x128xf32>
      tpu.vector_store %arg5[%c0_14, %c0_15, %c0_16, %c0_17], %17 {strides = array<i32>} : memref<1x2x1x128xf32, #tpu.memory_space<vmem>>, vector<1x2x1x128xf32>,
      %cst_18 = arith.constant 0.000000e+00 : f32
      %19 = vector.broadcast %cst_18 : f32 to vector<1x2x1x128xf32>
      %c0_19 = arith.constant 0 : index
      %c0_20 = arith.constant 0 : index
      %c0_21 = arith.constant 0 : index
      %c0_22 = arith.constant 0 : index
      %20 = vector.load %arg6[%c0_19, %c0_20, %c0_21, %c0_22] : memref<1x2x1x128xf32, #tpu.memory_space<vmem>>, vector<1x2x1x128xf32>
      tpu.vector_store %arg6[%c0_19, %c0_20, %c0_21, %c0_22], %19 {strides = array<i32>} : memref<1x2x1x128xf32, #tpu.memory_space<vmem>>, vector<1x2x1x128xf32>,
    } else {
    }
    %c0 = arith.constant 0 : index
    %c0_1 = arith.constant 0 : index
    %c0_2 = arith.constant 0 : index
    %3 = vector.load %arg2[%c0, %c0_1, %c0_2] : memref<2x8x128xbf16, #tpu.memory_space<vmem>>, vector<2x8x128xbf16>
    %4 = arith.extf %3 : vector<2x8x128xbf16> to vector<2x8x128xf32>
    %c0_3 = arith.constant 0 : index
    %c0_4 = arith.constant 0 : index
    %c0_5 = arith.constant 0 : index
    %5 = vector.load %arg3[%c0_3, %c0_4, %c0_5] : memref<2x8x128xbf16, #tpu.memory_space<vmem>>, vector<2x8x128xbf16>
    %6 = arith.extf %5 : vector<2x8x128xbf16> to vector<2x8x128xf32>
    %c1_i32 = arith.constant 1 : i32
    %7 = arith.muli %arg0, %c1_i32 : i32
    %8 = arith.addi %7, %arg1 : i32
    %c1_i32_6 = arith.constant 1 : i32
    %9 = arith.cmpi slt, %8, %c1_i32_6 : i32
    %10 = arith.extui %9 : i1 to i32
    %c0_i32_7 = arith.constant 0 : i32
    %11 = arith.cmpi ne, %10, %c0_i32_7 : i32
    scf.if %11 {
      %15 = math.absf %4 : vector<2x8x128xf32>
      %cst = arith.constant 0.000000e+00 : f32
      %16 = vector.broadcast %cst : f32 to vector<2x8x128xf32>
      %17 = arith.subf %16, %15 : vector<2x8x128xf32>
      %18 = math.exp %17 : vector<2x8x128xf32>
      %cst_9 = arith.constant 1.000000e+00 : f32
      %19 = vector.broadcast %cst_9 : f32 to vector<2x8x128xf32>
      %20 = arith.addf %19, %18 : vector<2x8x128xf32>
      %21 = tpu.reciprocal %20 {approx = true} : vector<2x8x128xf32> -> vector<2x8x128xf32>
      %cst_10 = arith.constant 0.000000e+00 : f32
      %22 = vector.broadcast %cst_10 : f32 to vector<2x8x128xf32>
      %23 = arith.cmpf oge, %4, %22 : vector<2x8x128xf32>
      %24 = arith.mulf %18, %21 : vector<2x8x128xf32>
      %25 = arith.select %23, %21, %24 : vector<2x8x128xi1>, vector<2x8x128xf32>
      %cst_11 = arith.constant 0.000000e+00 : f32
      %26 = vector.broadcast %cst_11 : f32 to vector<2x8x128xf32>
      %27 = arith.maximumf %4, %26 : vector<2x8x128xf32>
      %28 = arith.mulf %4, %6 : vector<2x8x128xf32>
      %29 = arith.subf %27, %28 : vector<2x8x128xf32>
      %30 = math.log1p %18 : vector<2x8x128xf32>
      %31 = arith.addf %29, %30 : vector<2x8x128xf32>
      %c0_12 = arith.constant 0 : index
      %c0_13 = arith.constant 0 : index
      %c0_14 = arith.constant 0 : index
      %c0_15 = arith.constant 0 : index
      %32 = vector.load %arg4[%c0_12, %c0_13, %c0_14, %c0_15] : memref<1x2x1x128xf32, #tpu.memory_space<vmem>>, vector<1x2x1x128xf32>
      %33 = arith.mulf %25, %6 : vector<2x8x128xf32>
      %cst_16 = arith.constant dense<0.000000e+00> : vector<2x128xf32>
      %34 = vector.multi_reduction <add>, %33, %cst_16 [1] : vector<2x8x128xf32> to vector<2x128xf32>
      %35 = vector.shape_cast %34 : vector<2x128xf32> to vector<2x1x128xf32>
      %36 = vector.shape_cast %35 : vector<2x1x128xf32> to vector<1x2x1x128xf32>
      %37 = arith.addf %32, %36 : vector<1x2x1x128xf32>
      %c0_17 = arith.constant 0 : index
      %c0_18 = arith.constant 0 : index
      %c0_19 = arith.constant 0 : index
      %c0_20 = arith.constant 0 : index
      %38 = vector.load %arg4[%c0_17, %c0_18, %c0_19, %c0_20] : memref<1x2x1x128xf32, #tpu.memory_space<vmem>>, vector<1x2x1x128xf32>
      tpu.vector_store %arg4[%c0_17, %c0_18, %c0_19, %c0_20], %37 {strides = array<i32>} : memref<1x2x1x128xf32, #tpu.memory_space<vmem>>, vector<1x2x1x128xf32>,
      %c0_21 = arith.constant 0 : index
      %c0_22 = arith.constant 0 : index
      %c0_23 = arith.constant 0 : index
      %c0_24 = arith.constant 0 : index
      %39 = vector.load %arg5[%c0_21, %c0_22, %c0_23, %c0_24] : memref<1x2x1x128xf32, #tpu.memory_space<vmem>>, vector<1x2x1x128xf32>
      %40 = arith.addf %25, %6 : vector<2x8x128xf32>
      %cst_25 = arith.constant dense<0.000000e+00> : vector<2x128xf32>
      %41 = vector.multi_reduction <add>, %40, %cst_25 [1] : vector<2x8x128xf32> to vector<2x128xf32>
      %42 = vector.shape_cast %41 : vector<2x128xf32> to vector<2x1x128xf32>
      %43 = vector.shape_cast %42 : vector<2x1x128xf32> to vector<1x2x1x128xf32>
      %44 = arith.addf %39, %43 : vector<1x2x1x128xf32>
      %c0_26 = arith.constant 0 : index
      %c0_27 = arith.constant 0 : index
      %c0_28 = arith.constant 0 : index
      %c0_29 = arith.constant 0 : index
      %45 = vector.load %arg5[%c0_26, %c0_27, %c0_28, %c0_29] : memref<1x2x1x128xf32, #tpu.memory_space<vmem>>, vector<1x2x1x128xf32>
      tpu.vector_store %arg5[%c0_26, %c0_27, %c0_28, %c0_29], %44 {strides = array<i32>} : memref<1x2x1x128xf32, #tpu.memory_space<vmem>>, vector<1x2x1x128xf32>,
      %c0_30 = arith.constant 0 : index
      %c0_31 = arith.constant 0 : index
      %c0_32 = arith.constant 0 : index
      %c0_33 = arith.constant 0 : index
      %46 = vector.load %arg6[%c0_30, %c0_31, %c0_32, %c0_33] : memref<1x2x1x128xf32, #tpu.memory_space<vmem>>, vector<1x2x1x128xf32>
      %cst_34 = arith.constant dense<0.000000e+00> : vector<2x128xf32>
      %47 = vector.multi_reduction <add>, %31, %cst_34 [1] : vector<2x8x128xf32> to vector<2x128xf32>
      %48 = vector.shape_cast %47 : vector<2x128xf32> to vector<2x1x128xf32>
      %49 = vector.shape_cast %48 : vector<2x1x128xf32> to vector<1x2x1x128xf32>
      %50 = arith.addf %46, %49 : vector<1x2x1x128xf32>
      %c0_35 = arith.constant 0 : index
      %c0_36 = arith.constant 0 : index
      %c0_37 = arith.constant 0 : index
      %c0_38 = arith.constant 0 : index
      %51 = vector.load %arg6[%c0_35, %c0_36, %c0_37, %c0_38] : memref<1x2x1x128xf32, #tpu.memory_space<vmem>>, vector<1x2x1x128xf32>
      tpu.vector_store %arg6[%c0_35, %c0_36, %c0_37, %c0_38], %50 {strides = array<i32>} : memref<1x2x1x128xf32, #tpu.memory_space<vmem>>, vector<1x2x1x128xf32>,
    } else {
    }
    %true = arith.constant true
    %12 = arith.xori %9, %true : i1
    %13 = arith.extui %12 : i1 to i32
    %c0_i32_8 = arith.constant 0 : i32
    %14 = arith.cmpi ne, %13, %c0_i32_8 : i32
    scf.if %14 {
      %c8_i32 = arith.constant 8 : i32
      %15 = arith.muli %8, %c8_i32 : i32
      %c8_i32_9 = arith.constant 8 : i32
      %16 = arith.subi %c8_i32_9, %15 : i32
      %17 = tpu.iota {dimensions = array<i32: 1>} : vector<1x8x128xi32>
      %18 = vector.broadcast %16 : i32 to vector<1x8x128xi32>
      %19 = arith.cmpi slt, %17, %18 : vector<1x8x128xi32>
      %cst = arith.constant -1.000000e+02 : f32
      %20 = vector.shape_cast %19 : vector<1x8x128xi1> to vector<1x8x128xi1>
      %21 = vector.broadcast %20 : vector<1x8x128xi1> to vector<2x8x128xi1>
      %22 = vector.broadcast %cst : f32 to vector<2x8x128xf32>
      %23 = arith.select %21, %4, %22 : vector<2x8x128xi1>, vector<2x8x128xf32>
      %cst_10 = arith.constant 0.000000e+00 : f32
      %24 = vector.shape_cast %19 : vector<1x8x128xi1> to vector<1x8x128xi1>
      %25 = vector.broadcast %24 : vector<1x8x128xi1> to vector<2x8x128xi1>
      %26 = vector.broadcast %cst_10 : f32 to vector<2x8x128xf32>
      %27 = arith.select %25, %6, %26 : vector<2x8x128xi1>, vector<2x8x128xf32>
      %28 = math.absf %23 : vector<2x8x128xf32>
      %cst_11 = arith.constant 0.000000e+00 : f32
      %29 = vector.broadcast %cst_11 : f32 to vector<2x8x128xf32>
      %30 = arith.subf %29, %28 : vector<2x8x128xf32>
      %31 = math.exp %30 : vector<2x8x128xf32>
      %cst_12 = arith.constant 1.000000e+00 : f32
      %32 = vector.broadcast %cst_12 : f32 to vector<2x8x128xf32>
      %33 = arith.addf %32, %31 : vector<2x8x128xf32>
      %34 = tpu.reciprocal %33 {approx = true} : vector<2x8x128xf32> -> vector<2x8x128xf32>
      %cst_13 = arith.constant 0.000000e+00 : f32
      %35 = vector.broadcast %cst_13 : f32 to vector<2x8x128xf32>
      %36 = arith.cmpf oge, %23, %35 : vector<2x8x128xf32>
      %37 = arith.mulf %31, %34 : vector<2x8x128xf32>
      %38 = arith.select %36, %34, %37 : vector<2x8x128xi1>, vector<2x8x128xf32>
      %cst_14 = arith.constant 0.000000e+00 : f32
      %39 = vector.broadcast %cst_14 : f32 to vector<2x8x128xf32>
      %40 = arith.maximumf %23, %39 : vector<2x8x128xf32>
      %41 = arith.mulf %23, %27 : vector<2x8x128xf32>
      %42 = arith.subf %40, %41 : vector<2x8x128xf32>
      %43 = math.log1p %31 : vector<2x8x128xf32>
      %44 = arith.addf %42, %43 : vector<2x8x128xf32>
      %c0_15 = arith.constant 0 : index
      %c0_16 = arith.constant 0 : index
      %c0_17 = arith.constant 0 : index
      %c0_18 = arith.constant 0 : index
      %45 = vector.load %arg4[%c0_15, %c0_16, %c0_17, %c0_18] : memref<1x2x1x128xf32, #tpu.memory_space<vmem>>, vector<1x2x1x128xf32>
      %46 = arith.mulf %38, %27 : vector<2x8x128xf32>
      %cst_19 = arith.constant dense<0.000000e+00> : vector<2x128xf32>
      %47 = vector.multi_reduction <add>, %46, %cst_19 [1] : vector<2x8x128xf32> to vector<2x128xf32>
      %48 = vector.shape_cast %47 : vector<2x128xf32> to vector<2x1x128xf32>
      %49 = vector.shape_cast %48 : vector<2x1x128xf32> to vector<1x2x1x128xf32>
      %50 = arith.addf %45, %49 : vector<1x2x1x128xf32>
      %c0_20 = arith.constant 0 : index
      %c0_21 = arith.constant 0 : index
      %c0_22 = arith.constant 0 : index
      %c0_23 = arith.constant 0 : index
      %51 = vector.load %arg4[%c0_20, %c0_21, %c0_22, %c0_23] : memref<1x2x1x128xf32, #tpu.memory_space<vmem>>, vector<1x2x1x128xf32>
      tpu.vector_store %arg4[%c0_20, %c0_21, %c0_22, %c0_23], %50 {strides = array<i32>} : memref<1x2x1x128xf32, #tpu.memory_space<vmem>>, vector<1x2x1x128xf32>,
      %c0_24 = arith.constant 0 : index
      %c0_25 = arith.constant 0 : index
      %c0_26 = arith.constant 0 : index
      %c0_27 = arith.constant 0 : index
      %52 = vector.load %arg5[%c0_24, %c0_25, %c0_26, %c0_27] : memref<1x2x1x128xf32, #tpu.memory_space<vmem>>, vector<1x2x1x128xf32>
      %53 = arith.addf %38, %27 : vector<2x8x128xf32>
      %cst_28 = arith.constant dense<0.000000e+00> : vector<2x128xf32>
      %54 = vector.multi_reduction <add>, %53, %cst_28 [1] : vector<2x8x128xf32> to vector<2x128xf32>
      %55 = vector.shape_cast %54 : vector<2x128xf32> to vector<2x1x128xf32>
      %56 = vector.shape_cast %55 : vector<2x1x128xf32> to vector<1x2x1x128xf32>
      %57 = arith.addf %52, %56 : vector<1x2x1x128xf32>
      %c0_29 = arith.constant 0 : index
      %c0_30 = arith.constant 0 : index
      %c0_31 = arith.constant 0 : index
      %c0_32 = arith.constant 0 : index
      %58 = vector.load %arg5[%c0_29, %c0_30, %c0_31, %c0_32] : memref<1x2x1x128xf32, #tpu.memory_space<vmem>>, vector<1x2x1x128xf32>
      tpu.vector_store %arg5[%c0_29, %c0_30, %c0_31, %c0_32], %57 {strides = array<i32>} : memref<1x2x1x128xf32, #tpu.memory_space<vmem>>, vector<1x2x1x128xf32>,
      %c0_33 = arith.constant 0 : index
      %c0_34 = arith.constant 0 : index
      %c0_35 = arith.constant 0 : index
      %c0_36 = arith.constant 0 : index
      %59 = vector.load %arg6[%c0_33, %c0_34, %c0_35, %c0_36] : memref<1x2x1x128xf32, #tpu.memory_space<vmem>>, vector<1x2x1x128xf32>
      %cst_37 = arith.constant dense<0.000000e+00> : vector<2x128xf32>
      %60 = vector.multi_reduction <add>, %44, %cst_37 [1] : vector<2x8x128xf32> to vector<2x128xf32>
      %61 = vector.shape_cast %60 : vector<2x128xf32> to vector<2x1x128xf32>
      %62 = vector.shape_cast %61 : vector<2x1x128xf32> to vector<1x2x1x128xf32>
      %63 = arith.addf %59, %62 : vector<1x2x1x128xf32>
      %c0_38 = arith.constant 0 : index
      %c0_39 = arith.constant 0 : index
      %c0_40 = arith.constant 0 : index
      %c0_41 = arith.constant 0 : index
      %64 = vector.load %arg6[%c0_38, %c0_39, %c0_40, %c0_41] : memref<1x2x1x128xf32, #tpu.memory_space<vmem>>, vector<1x2x1x128xf32>
      tpu.vector_store %arg6[%c0_38, %c0_39, %c0_40, %c0_41], %63 {strides = array<i32>} : memref<1x2x1x128xf32, #tpu.memory_space<vmem>>, vector<1x2x1x128xf32>,
    } else {
    }
    return
  }
  func.func @transform_0(%arg0: i32, %arg1: i32) -> (i32, i32, i32) {
    %c1_i32 = arith.constant 1 : i32
    %0 = arith.muli %arg0, %c1_i32 : i32
    %1 = arith.addi %0, %arg1 : i32
    %c0_i32 = arith.constant 0 : i32
    %2 = arith.minsi %1, %c0_i32 : i32
    %c0_i32_0 = arith.constant 0 : i32
    %c0_i32_1 = arith.constant 0 : i32
    %c0_i32_2 = arith.constant 0 : i32
    return %c0_i32_0, %2, %c0_i32_1 : i32, i32, i32
  }
  func.func @transform_1(%arg0: i32, %arg1: i32) -> (i32, i32, i32) {
    %c1_i32 = arith.constant 1 : i32
    %0 = arith.muli %arg0, %c1_i32 : i32
    %1 = arith.addi %0, %arg1 : i32
    %c0_i32 = arith.constant 0 : i32
    %2 = arith.minsi %1, %c0_i32 : i32
    %c0_i32_0 = arith.constant 0 : i32
    %c0_i32_1 = arith.constant 0 : i32
    %c0_i32_2 = arith.constant 0 : i32
    return %c0_i32_0, %2, %c0_i32_1 : i32, i32, i32
  }
  func.func @transform_2(%arg0: i32, %arg1: i32) -> (i32, i32, i32, i32) {
    %c0_i32 = arith.constant 0 : i32
    %c0_i32_0 = arith.constant 0 : i32
    %c0_i32_1 = arith.constant 0 : i32
    %c0_i32_2 = arith.constant 0 : i32
    return %arg0, %c0_i32, %c0_i32_0, %c0_i32_1 : i32, i32, i32, i32
  }
  func.func @transform_3(%arg0: i32, %arg1: i32) -> (i32, i32, i32, i32) {
    %c0_i32 = arith.constant 0 : i32
    %c0_i32_0 = arith.constant 0 : i32
    %c0_i32_1 = arith.constant 0 : i32
    %c0_i32_2 = arith.constant 0 : i32
    return %arg0, %c0_i32, %c0_i32_0, %c0_i32_1 : i32, i32, i32, i32
  }
  func.func @transform_4(%arg0: i32, %arg1: i32) -> (i32, i32, i32, i32) {
    %c0_i32 = arith.constant 0 : i32
    %c0_i32_0 = arith.constant 0 : i32
    %c0_i32_1 = arith.constant 0 : i32
    %c0_i32_2 = arith.constant 0 : i32
    return %arg0, %c0_i32, %c0_i32_0, %c0_i32_1 : i32, i32, i32, i32
  }
}

</mosaic_0001>

<bundles_post_ra>
// kernel: tpu_custom_call.1
= control target key start
LH: loop header
LB: loop body
LE: loop exit
PB: predicated region body
PF: predicated region fallthrough
CT: control target
= control target key end

     0   :  { %10 = vsyncpa [#allocation3], 0  ;;  %s1592_s0 = inlined_call_operand.hbm [shape: bf16[2,8,128], index: 0, kind: input, shape index: {}]   ;;  %s1593_s1 = inlined_call_operand.hbm [shape: bf16[2,8,128], index: 1, kind: input, shape index: {}]   ;;  %s1594_s2 = inlined_call_operand.hbm [shape: f32[2,2,1,128], index: 2, kind: output, shape index: {0}]   ;;  %s1595_s3 = inlined_call_operand.hbm [shape: f32[2,2,1,128], index: 3, kind: output, shape index: {1}]   ;;  %s1596_s4 = inlined_call_operand.hbm [shape: f32[2,2,1,128], index: 4, kind: output, shape index: {2}]  }
   0x1   :  { %12 = vsyncpa [#allocation3 + $0x1], 0 }
   0x2   :  { %13 = vsyncpa [#allocation6], 0 }
   0x3   :  { %15 = vsyncpa [#allocation6 + $0x1], 0 }
   0x4   :  { %16 = vsyncpa [#allocation4], 0 }
   0x5   :  { %18 = vsyncpa [#allocation4 + $0x1], 0 }
   0x6   :  { %19 = vsyncpa [#allocation9], 0 }
   0x7   :  { %21 = vsyncpa [#allocation9 + $0x1], 0  ;;  %s1205_s15 = smov 0   ;;  %s1207_s16 = smov 0  }
   0x8   :  { %s1209_s17 = smov 0   ;;  %s1211_s18 = smov 0  }
   0x9   :  { %s1213_s19 = smov 0   ;;  %s1215_s20 = smov 0  }
   0xa   :  { %s1217_s21 = smov 0   ;;  %s1219_s22 = smov 0  }
   0xb LB: > { %s1244_s23 = sadd.s32 4294967295, %s1168_s22   ;;  %s1599_s24 = sadd.s32 4294967294, %s1168_s22   ;;  %s1168_s22 = sphi %s1219_s22, %s27_s22   ;;  %s1164_s21 = sphi %s1217_s21, %s1626_s21   ;;  %s1160_s20 = sphi %s1215_s20, %s1625_s20   ;;  %s1156_s19 = sphi %s1213_s19, %s1582_s19   ;;  %s1152_s18 = sphi %s1211_s18, %s1624_s18   ;;  %s1148_s17 = sphi %s1209_s17, %s1623_s17   ;;  %s1144_s16 = sphi %s1207_s16, %s1622_s16   ;;  %s1140_s15 = sphi %s1205_s15, %s1621_s15  }
   0xc   : > { %s39_s25 = sadd.s32 1, %s1164_s21  ;;  %p1137_p1 = scmp.ne.s32.totalorder %s1156_s19, 0 }
   0xd   : > { %p41_p0 = scmp.ge.s32.totalorder %s39_s25, 2  ;;  %p60_p2 = scmp.eq.s32.totalorder %s1168_s22, 0 }
   0xe   : > { %p65_p3 = scmp.ne.s32.totalorder %s1156_s19, %s1152_s18  ;;  %p66_p5 = scmp.eq.s32.totalorder %s1244_s23, 0 }
   0xf   : > { %s1628_s25 = smov (%p41_p0, %s39_s25), 0  ;;  %p1253_p4 = por %p1137_p1, %p60_p2 }
  0x10   : > { %1601 = sst [smem:[#allocation15_spill]] %s1628_s25  ;;  %p1258_p6 = por %p66_p5, %p65_p3 }
  0x11   : > { %s107_s28 = ssub.s32 %s1164_s21, %s1628_s25  ;;  %s110_s29 = sadd.s32 1, %s1148_s17 }
  0x12   : > { %s1603_s27 = scalar_select %p1258_p6, 1, 0 }
  0x13   : > { %p108_p7 = scmp.eq.s32.totalorder %s107_s28, 0  ;;  %p120_p8 = scmp.ne.s32.totalorder %s1148_s17, %s1144_s16 }
  0x14   : > { %p121_p9 = scmp.eq.s32.totalorder %s1244_s23, 1  ;;  %p126_p10 = scmp.ne.s32.totalorder %s1144_s16, %s1140_s15 }
  0x15   : > { %s1266_s30 = scalar_select %p108_p7, %s1148_s17, %s110_s29  }
  0x16   : > { %p127_p11 = scmp.eq.s32.totalorder %s1599_s24, 1  ;;  %p1275_p12 = por %p121_p9, %p120_p8 }
  0x17   : > { %p838_p1 = scmp.lt.s32.totalorder %s1168_s22, 2  ;;  %s1170_s7 = smov [#allocation2]  }
  0x18   : > { %s1604_s5 = scalar_select %p1275_p12, 1, 0 }
  0x19   : > { %p1280_p0 = por %p127_p11, %p126_p10  ;;  %s212_s8 = sshll.u32 %s1170_s7, 4  ;;  %s213_s8 = int_to_ptr.vmem [resolvable:$true] %s212_s8 }
  0x1a   : > { %p1287_p2 = pnand %p838_p1, %p1253_p4  ;;  %s941_s12 = scalar_lea.hbm %s1592_s0, 128 }
  0x1b   : > { %s1605_s6 = scalar_select %p1280_p0, 1, 0 }
  0x1c   : > { %p942_p3 = scmp.ne.s32.totalorder %s1592_s0, %s941_s12  ;;  %p943_p5 = pneg %p1287_p2 }
  0x1d   : > { %p948_p8 = scmp.lt.u32.totalorder %s941_s12, %s941_s12  ;;  %p950_p9 = scmp.lt.u32.totalorder %s941_s12, %s1592_s0 }
  0x1e   : > { %p944_p7 = pnand %p943_p5, %p942_p3 }
  0x1f   : > { %p951_p10 = por %p950_p9, %p948_p8 }
  0x20   : > { %p945_p4 = pneg %p944_p7 }
  0x22   : > { %p952_p11 = pnand %p951_p10, %p945_p4 }
  0x24   : > { %955 = shalt.err (!%p952_p11)
}
  0x25   : > { %s956_s28 = scalar_lea.vmem %s213_s8, 128  ;;  %s963_s29 = scalar_lea.vmem %s213_s8, 256 }
  0x26   : > { %p957_p1 = scmp.ne.s32.totalorder %s213_s8, %s956_s28  ;;  %p964_p12 = scmp.lt.s32.totalorder %s213_s8, %s213_s8 }
  0x27   : > { %p965_p6 = scmp.lt.s32.totalorder %s963_s29, %s956_s28 }
  0x28   : > { %p959_p13 = pnand %p957_p1, %p943_p5 }
  0x29   : > { %p966_p3 = por %p965_p6, %p964_p12 }
  0x2a   : > { %p960_p0 = pneg %p959_p13 }
  0x2c   : > { %p967_p7 = pnand %p966_p3, %p960_p0 }
  0x2e   : > { %970 = shalt.err (!%p967_p7)
}
  0x2f   : > { %s1171_s7 = smov 64   ;;  %s1172_s10 = smov 4  }
  0x30   : > { %824 = dma.hbm_to_vmem [thread:$0]  (!%p1287_p2), %s1592_s0, 128, %s213_s8, [#allocation3], %s1171_s7, %s1171_s7, %s1172_s10  }
  0x31   : > { %p780_p13 = scmp.ge.s32.totalorder %s1168_s22, 1  ;;  %p243_p4 = scmp.lt.s32.totalorder %s1168_s22, 3 }
  0x32   : > { %s1173_s14 = smov [#allocation5]   ;;  %s971_s29 = scalar_lea.hbm %s1593_s1, 128 }
  0x33   : > { %p1318_p8 = pnand %p780_p13, %p243_p4  ;;  %s235_s18 = sshll.u32 %s1173_s14, 4  ;;  %s236_s18 = int_to_ptr.vmem [resolvable:$true] %s235_s18 }
  0x34   : > { %p972_p6 = scmp.ne.s32.totalorder %s1593_s1, %s971_s29  ;;  %p978_p9 = scmp.lt.u32.totalorder %s971_s29, %s971_s29 }
  0x35   : > { %s1607_s13 = scalar_select %p1318_p8, 1, 0 }
  0x36   : > { %p974_p12 = pnand %p972_p6, %p943_p5  ;;  %p980_p10 = scmp.lt.u32.totalorder %s971_s29, %s1593_s1 }
  0x38   : > { %p975_p0 = pneg %p974_p12  ;;  %p981_p11 = por %p980_p10, %p978_p9 }
  0x3a   : > { %p982_p1 = pnand %p981_p11, %p975_p0 }
  0x3c   : > { %985 = shalt.err (!%p982_p1)
}
  0x3d   : > { %s986_s12 = scalar_lea.vmem %s236_s18, 128  ;;  %s993_s24 = scalar_lea.vmem %s236_s18, 256 }
  0x3e   : > { %p987_p3 = scmp.ne.s32.totalorder %s236_s18, %s986_s12  ;;  %p994_p4 = scmp.lt.s32.totalorder %s236_s18, %s236_s18 }
  0x3f   : > { %p995_p8 = scmp.lt.s32.totalorder %s993_s24, %s986_s12 }
  0x40   : > { %p989_p7 = pnand %p987_p3, %p943_p5 }
  0x41   : > { %p996_p6 = por %p995_p8, %p994_p4 }
  0x42   : > { %p990_p13 = pneg %p989_p7 }
  0x44   : > { %p997_p12 = pnand %p996_p6, %p990_p13 }
  0x46   : > { %1000 = shalt.err (!%p997_p12)
}
  0x47   : > { %827 = dma.hbm_to_vmem [thread:$0]  (!%p1287_p2), %s1593_s1, 128, %s236_s18, [#allocation6], %s1171_s7, %s1171_s7, %s1172_s10  }
  0x48   : > { %p1608_p0 = scmp.ne.s32.totalorder %s1607_s13, 0 }
  0x49   : > { %s249_s26 = sand.u32 (!%p1608_p0), 1, %s1156_s19   ;;  %p1609_p5 = scmp.ne.s32.totalorder (!%p1608_p0), %s1603_s27, 0 }
  0x4a   : > { %247 = sbr.rel (%p1608_p0) target bundleno = 274 (0x112), region = 28  ;;  %s781_s28 = sshll.u32 (!%p1608_p0), %s249_s26, 3 }
  0x4b   : > { %s250_s29 = scalar_lea.sflag (!%p1608_p0), [#allocation3], %s249_s26  ;;  %s253_s8 = scalar_lea.vmem (!%p1608_p0), [#allocation2], %s781_s28 }
  0x51   : > { %1122 = dma.done.wait (%p1609_p5), %s250_s29, 128  }
  0x52   : > { %1124 = vsyncadd (%p1609_p5), %s250_s29, 4294967168  ;;  %s259_s9 = scalar_lea.sflag [#allocation6], %s249_s26  ;;  %s262_s11 = scalar_lea.vmem [#allocation5], %s781_s28 }
  0x53   : > { %1126 = dma.done.wait (%p1609_p5), %s259_s9, 128  }
  0x54   : > { %1128 = vsyncadd (%p1609_p5), %s259_s9, 4294967168  ;;  %s285_s7 = sand.u32 1, %s1144_s16   ;;  %v1174_v0 = vmov 0.0   ;;  %v804_v1 = vld [vmem:[%s253_s8] sm:$0xff]   ;;  %v808_v2 = vld [vmem:[%s262_s11] sm:$0xff]   ;;  %p786_p2 = scmp.ge.s32.totalorder %s1160_s20, 1 }
  0x55   : > { %s783_s10 = sshll.u32 %s285_s7, 1  ;;  %v1371_v3 = vunpack.c.l.bf16 %v804_v1  ;;  %v1373_v4 = vunpack.c.h.bf16 %v804_v1  ;;  %v1375_v5 = vunpack.c.l.bf16 %v808_v2  ;;  %v1377_v6 = vunpack.c.h.bf16 %v808_v2 }
  0x56   : > { %s1359_s13 = scalar_lea.vmem [#allocation7], %s783_s10  ;;  %s1363_s18 = scalar_lea.vmem [#allocation8], %s783_s10 }
  0x57   : > { %312 = vst [vmem:[%s1359_s13] sm:$0x1] %v1174_v0  ;;  %313 = vst [vmem:[%s1359_s13 + $0x1] sm:$0x1] %v1174_v0  ;;  %s1367_s27 = scalar_lea.vmem [#allocation10], %s783_s10  ;;  %330 = sbr.rel (%p786_p2) target bundleno = 141 (0x8d), region = 44  ;;  %v349_v20 = vmax.f32 (!%p786_p2), %v1371_v3, 0.0  ;;  %v351_v21 = vmul.f32 (!%p786_p2), %v1375_v5, %v1371_v3  ;;  %v352_v25 = vmul.f32 (!%p786_p2), %v1377_v6, %v1373_v4 }
  0x58   : > { %314 = vst [vmem:[%s1363_s18] sm:$0x1] %v1174_v0  ;;  %315 = vst [vmem:[%s1363_s18 + $0x1] sm:$0x1] %v1174_v0  ;;  %v331_v7 = vand.u32 (!%p786_p2), 2147483647, %v1371_v3  ;;  %v350_v24 = vmax.f32 (!%p786_p2), %v1373_v4, 0.0 }
  0x59   : > { %316 = vst [vmem:[%s1367_s27] sm:$0x1] %v1174_v0  ;;  %317 = vst [vmem:[%s1367_s27 + $0x1] sm:$0x1] %v1174_v0  ;;  %v332_v8 = vand.u32 (!%p786_p2), 2147483647, %v1373_v4  ;;  %vm343_vm0 = vcmp.ge.f32.partialorder (!%p786_p2), %v1371_v3, 0.0  ;;  %v353_v33 = vsub.f32 (!%p786_p2), %v349_v20, %v351_v21 }
  0x5a   : > { %v333_v9 = vsub.f32 (!%p786_p2), 0.0, %v331_v7  ;;  %vm344_vm1 = vcmp.ge.f32.partialorder (!%p786_p2), %v1373_v4, 0.0  ;;  %v354_v39 = vsub.f32 (!%p786_p2), %v350_v24, %v352_v25 }
  0x5b   : > { %v334_v10 = vsub.f32 (!%p786_p2), 0.0, %v332_v8 }
  0x5c   : > { %v335_v11 = vmul.f32 (!%p786_p2), 1.442695, %v333_v9 }
  0x5d   : > { %v337_v12 = vmul.f32 (!%p786_p2), 1.442695, %v334_v10 }
  0x5e   : > { %917 = vpow2.f32 %v335_v11  ;;  %v376_v21 = vld [vmem:[%s1359_s13 + $0x1] sm:$0x1] }
  0x5f   : > { %919 = vpow2.f32 %v337_v12 }
  0x68   : > { %v918_v13 = vpop.eup %917 }
  0x69   : > { %v920_v14 = vpop.eup %919  ;;  %v339_v15 = vadd.f32 1.0, %v918_v13  ;;  %v358_v17 = vmul.f32 -0.5, %v918_v13  ;;  %v361_v22 = vand.u32 2147483647, %v918_v13 }
  0x6a   : > { %v340_v16 = vadd.f32 1.0, %v920_v14  ;;  %v367_v18 = vmul.f32 -0.5, %v920_v14  ;;  %v370_v26 = vand.u32 2147483647, %v920_v14 }
  0x6b   : > { %921 = vrcp.f32 %v339_v15  ;;  %v359_v19 = vadd.f32 1.0, %v358_v17  ;;  %vm1390_vm2 = vcmp.lt.f32.partialorder %v361_v22, 0.0004427343  ;;  %v395_v17 = vld [vmem:[%s1363_s18] sm:$0x1] }
  0x6c   : > { %923 = vrcp.f32 %v340_v16  ;;  %v368_v23 = vadd.f32 1.0, %v367_v18  ;;  %vm371_vm3 = vcmp.lt.f32.partialorder %v370_v26, 0.0004427343 }
  0x6d   : > { %925 = vlog2.f32 %v339_v15  ;;  %v360_v30 = vmul.f32 %v918_v13, %v359_v19  ;;  %v375_v15 = vld [vmem:[%s1359_s13] sm:$0x1] }
  0x6e   : > { %927 = vlog2.f32 %v340_v16  ;;  %v369_v35 = vmul.f32 %v920_v14, %v368_v23  ;;  %v396_v23 = vld [vmem:[%s1363_s18 + $0x1] sm:$0x1] }
  0x75   : > { %v922_v27 = vpop.eup %921 }
  0x76   : > { %v924_v28 = vpop.eup %923  ;;  %v345_v29 = vmul.f32 %v922_v27, %v918_v13 }
  0x77   : > { %v926_v31 = vpop.eup %925  ;;  %v346_v32 = vmul.f32 %v924_v28, %v920_v14 }
  0x78   : > { %v928_v36 = vpop.eup %927  ;;  %v347_v37 = vsel %vm343_vm0, %v922_v27, %v345_v29  ;;  %v357_v38 = vmul.f32 0.6931472, %v926_v31  ;;  %v415_v27 = vld [vmem:[%s1367_s27] sm:$0x1] }
  0x79   : > { %v377_v40 = vmul.f32 %v1375_v5, %v347_v37  ;;  %v348_v41 = vsel %vm344_vm1, %v924_v28, %v346_v32  ;;  %v397_v42 = vadd.f32 %v1375_v5, %v347_v37  ;;  %v366_v43 = vmul.f32 0.6931472, %v928_v36  ;;  %v416_v32 = vld [vmem:[%s1367_s27 + $0x1] sm:$0x1] }
  0x7a   : > { %v378_v44 = vmul.f32 %v1377_v6, %v348_v41  ;;  %v398_v45 = vadd.f32 %v1377_v6, %v348_v41  ;;  %v363_v46 = vsel %vm1390_vm2, %v360_v30, %v357_v38 }
  0x7b   : > { %v379_v47 = vrot.slane %v377_v40, 4  ;;  %v399_v48 = vrot.slane %v397_v42, 4  ;;  %v373_v49 = vadd.f32 %v363_v46, %v353_v33  ;;  %v372_v50 = vsel %vm371_vm3, %v369_v35, %v366_v43 }
  0x7c   : > { %v385_v51 = vrot.slane %v378_v44, 4  ;;  %v405_v52 = vrot.slane %v398_v45, 4  ;;  %v374_v53 = vadd.f32 %v372_v50, %v354_v39 }
  0x7d   : > { %v380_v54 = vadd.f32 %v379_v47, %v377_v40  ;;  %v400_v55 = vadd.f32 %v399_v48, %v397_v42  ;;  %v417_v56 = vrot.slane %v373_v49, 4 }
  0x7e   : > { %v386_v57 = vadd.f32 %v385_v51, %v378_v44  ;;  %v406_v58 = vadd.f32 %v405_v52, %v398_v45  ;;  %v423_v59 = vrot.slane %v374_v53, 4 }
  0x7f   : > { %v381_v60 = vrot.slane %v380_v54, 2  ;;  %v401_v61 = vrot.slane %v400_v55, 2  ;;  %v418_v62 = vadd.f32 %v417_v56, %v373_v49 }
  0x80   : > { %v387_v63 = vrot.slane %v386_v57, 2  ;;  %v407_v0 = vrot.slane %v406_v58, 2  ;;  %v424_v1 = vadd.f32 %v423_v59, %v374_v53 }
  0x81   : > { %v382_v2 = vadd.f32 %v381_v60, %v380_v54  ;;  %v402_v7 = vadd.f32 %v401_v61, %v400_v55  ;;  %v419_v8 = vrot.slane %v418_v62, 2 }
  0x82   : > { %v388_v9 = vadd.f32 %v387_v63, %v386_v57  ;;  %v408_v10 = vadd.f32 %v407_v0, %v406_v58  ;;  %v425_v11 = vrot.slane %v424_v1, 2 }
  0x83   : > { %v383_v12 = vrot.slane %v382_v2, 1  ;;  %v403_v13 = vrot.slane %v402_v7, 1  ;;  %v420_v14 = vadd.f32 %v419_v8, %v418_v62 }
  0x84   : > { %v389_v16 = vrot.slane %v388_v9, 1  ;;  %v409_v18 = vrot.slane %v408_v10, 1  ;;  %v426_v19 = vadd.f32 %v425_v11, %v424_v1 }
  0x85   : > { %v384_v20 = vadd.f32 %v383_v12, %v382_v2  ;;  %v404_v22 = vadd.f32 %v403_v13, %v402_v7  ;;  %v421_v24 = vrot.slane %v420_v14, 1 }
  0x86   : > { %v390_v25 = vadd.f32 %v389_v16, %v388_v9  ;;  %v410_v26 = vadd.f32 %v409_v18, %v408_v10  ;;  %v427_v28 = vrot.slane %v426_v19, 1 }
  0x87   : > { %v391_v29 = vadd.f32 %v384_v20, %v375_v15  ;;  %v411_v30 = vadd.f32 %v404_v22, %v395_v17  ;;  %v422_v31 = vadd.f32 %v421_v24, %v420_v14 }
  0x88   : > { %v392_v33 = vadd.f32 %v390_v25, %v376_v21  ;;  %v412_v34 = vadd.f32 %v410_v26, %v396_v23  ;;  %v428_v35 = vadd.f32 %v427_v28, %v426_v19 }
  0x89   : > { %393 = vst [vmem:[%s1359_s13] sm:$0x1] %v391_v29  ;;  %413 = vst [vmem:[%s1363_s18] sm:$0x1] %v411_v30  ;;  %v429_v36 = vadd.f32 %v422_v31, %v415_v27 }
  0x8a   : > { %394 = vst [vmem:[%s1359_s13 + $0x1] sm:$0x1] %v392_v33  ;;  %414 = vst [vmem:[%s1363_s18 + $0x1] sm:$0x1] %v412_v34  ;;  %v430_v37 = vadd.f32 %v428_v35, %v416_v32 }
  0x8b   : > { %431 = vst [vmem:[%s1367_s27] sm:$0x1] %v429_v36 }
  0x8c   : > { %432 = vst [vmem:[%s1367_s27 + $0x1] sm:$0x1] %v430_v37 }
  0x8d PF: > { %p787_p8 = scmp.lt.s32.totalorder %s1160_s20, 1 }
  0x8e   : > { %s788_s12 = sshll.u32 (!%p787_p8), %s1160_s20, 3  ;;  %v439_v38 = vlaneseq (!%p787_p8) }
  0x8f   : > { %436 = sbr.rel (%p787_p8) target bundleno = 201 (0xc9), region = 48  ;;  %s438_s24 = ssub.s32 (!%p787_p8), 8, %s788_s12 }
  0x90   : > { %v440_v39 = vshrl.u32 (!%p787_p8), %v439_v38, 7  ;;  %v441_v40 = vstv (!%p787_p8), %s438_s24 }
  0x92   : > { %vm1414_vm4 = vcmp.lt.s32.totalorder (!%p787_p8), %v440_v39, %v441_v40 }
  0x93   : > { %v445_v42 = vsel (!%p787_p8), %vm1414_vm4, %v1371_v3, -100.0  ;;  %v446_v43 = vsel (!%p787_p8), %vm1414_vm4, %v1373_v4, -100.0  ;;  %v447_v4 = vsel (!%p787_p8), %vm1414_vm4, %v1375_v5, 0.0  ;;  %v448_v55 = vsel (!%p787_p8), %vm1414_vm4, %v1377_v6, 0.0 }
  0x94   : > { %v449_v44 = vand.u32 (!%p787_p8), 2147483647, %v445_v42  ;;  %v450_v45 = vand.u32 (!%p787_p8), 2147483647, %v446_v43  ;;  %v467_v57 = vmax.f32 (!%p787_p8), %v445_v42, 0.0  ;;  %v469_v58 = vmul.f32 (!%p787_p8), %v447_v4, %v445_v42 }
  0x95   : > { %v468_v61 = vmax.f32 (!%p787_p8), %v446_v43, 0.0  ;;  %v470_v62 = vmul.f32 (!%p787_p8), %v448_v55, %v446_v43  ;;  %vm461_vm5 = vcmp.ge.f32.partialorder (!%p787_p8), %v445_v42, 0.0  ;;  %vm462_vm6 = vcmp.ge.f32.partialorder (!%p787_p8), %v446_v43, 0.0 }
  0x96   : > { %v451_v46 = vsub.f32 0.0, %v449_v44  ;;  %v452_v47 = vsub.f32 0.0, %v450_v45  ;;  %v471_v9 = vsub.f32 %v467_v57, %v469_v58 }
  0x97   : > { %v472_v14 = vsub.f32 %v468_v61, %v470_v62 }
  0x98   : > { %v453_v48 = vmul.f32 1.442695, %v451_v46  ;;  %v455_v49 = vmul.f32 1.442695, %v452_v47 }
  0x9a   : > { %929 = vpow2.f32 %v453_v48 }
  0x9b   : > { %931 = vpow2.f32 %v455_v49 }
  0xa4   : > { %v930_v50 = vpop.eup %929 }
  0xa5   : > { %v932_v51 = vpop.eup %931  ;;  %v457_v52 = vadd.f32 1.0, %v930_v50  ;;  %v476_v3 = vmul.f32 -0.5, %v930_v50  ;;  %v479_v59 = vand.u32 2147483647, %v930_v50 }
  0xa6   : > { %v458_v53 = vadd.f32 1.0, %v932_v51  ;;  %v485_v54 = vmul.f32 -0.5, %v932_v51  ;;  %v488_v63 = vand.u32 2147483647, %v932_v51 }
  0xa7   : > { %933 = vrcp.f32 %v457_v52  ;;  %v477_v56 = vadd.f32 1.0, %v476_v3  ;;  %vm1430_vm7 = vcmp.lt.f32.partialorder %v479_v59, 0.0004427343 }
  0xa8   : > { %935 = vrcp.f32 %v458_v53  ;;  %v486_v60 = vadd.f32 1.0, %v485_v54  ;;  %vm489_vm8 = vcmp.lt.f32.partialorder %v488_v63, 0.0004427343 }
  0xa9   : > { %937 = vlog2.f32 %v457_v52  ;;  %v478_v7 = vmul.f32 %v930_v50, %v477_v56  ;;  %v513_v52 = vld [vmem:[%s1363_s18] sm:$0x1]  ;;  %v514_v56 = vld [vmem:[%s1363_s18 + $0x1] sm:$0x1] }
  0xaa   : > { %939 = vlog2.f32 %v458_v53  ;;  %v487_v6 = vmul.f32 %v932_v51, %v486_v60  ;;  %v533_v60 = vld [vmem:[%s1367_s27] sm:$0x1] }
  0xb1   : > { %v934_v0 = vpop.eup %933 }
  0xb2   : > { %v936_v1 = vpop.eup %935  ;;  %v463_v2 = vmul.f32 %v934_v0, %v930_v50  ;;  %v493_v50 = vld [vmem:[%s1359_s13] sm:$0x1] }
  0xb3   : > { %v938_v8 = vpop.eup %937  ;;  %v464_v5 = vmul.f32 %v936_v1, %v932_v51 }
  0xb4   : > { %v940_v11 = vpop.eup %939  ;;  %v465_v12 = vsel %vm461_vm5, %v934_v0, %v463_v2  ;;  %v475_v13 = vmul.f32 0.6931472, %v938_v8 }
  0xb5   : > { %v495_v15 = vmul.f32 %v465_v12, %v447_v4  ;;  %v466_v16 = vsel %vm462_vm6, %v936_v1, %v464_v5  ;;  %v515_v17 = vadd.f32 %v465_v12, %v447_v4  ;;  %v484_v18 = vmul.f32 0.6931472, %v940_v11  ;;  %v494_v4 = vld [vmem:[%s1359_s13 + $0x1] sm:$0x1]  ;;  %v534_v1 = vld [vmem:[%s1367_s27 + $0x1] sm:$0x1] }
  0xb6   : > { %v496_v19 = vmul.f32 %v466_v16, %v448_v55  ;;  %v516_v20 = vadd.f32 %v466_v16, %v448_v55  ;;  %v481_v21 = vsel %vm1430_vm7, %v478_v7, %v475_v13 }
  0xb7   : > { %v497_v22 = vrot.slane %v495_v15, 4  ;;  %v517_v23 = vrot.slane %v515_v17, 4  ;;  %v491_v24 = vadd.f32 %v481_v21, %v471_v9  ;;  %v490_v25 = vsel %vm489_vm8, %v487_v6, %v484_v18 }
  0xb8   : > { %v503_v26 = vrot.slane %v496_v19, 4  ;;  %v523_v27 = vrot.slane %v516_v20, 4  ;;  %v492_v28 = vadd.f32 %v490_v25, %v472_v14 }
  0xb9   : > { %v498_v29 = vadd.f32 %v497_v22, %v495_v15  ;;  %v518_v30 = vadd.f32 %v517_v23, %v515_v17  ;;  %v535_v31 = vrot.slane %v491_v24, 4 }
  0xba   : > { %v504_v32 = vadd.f32 %v503_v26, %v496_v19  ;;  %v524_v33 = vadd.f32 %v523_v27, %v516_v20  ;;  %v541_v34 = vrot.slane %v492_v28, 4 }
  0xbb   : > { %v499_v35 = vrot.slane %v498_v29, 2  ;;  %v519_v36 = vrot.slane %v518_v30, 2  ;;  %v536_v37 = vadd.f32 %v535_v31, %v491_v24 }
  0xbc   : > { %v505_v38 = vrot.slane %v504_v32, 2  ;;  %v525_v39 = vrot.slane %v524_v33, 2  ;;  %v542_v40 = vadd.f32 %v541_v34, %v492_v28 }
  0xbd   : > { %v500_v41 = vadd.f32 %v499_v35, %v498_v29  ;;  %v520_v42 = vadd.f32 %v519_v36, %v518_v30  ;;  %v537_v43 = vrot.slane %v536_v37, 2 }
  0xbe   : > { %v506_v44 = vadd.f32 %v505_v38, %v504_v32  ;;  %v526_v45 = vadd.f32 %v525_v39, %v524_v33  ;;  %v543_v46 = vrot.slane %v542_v40, 2 }
  0xbf   : > { %v501_v47 = vrot.slane %v500_v41, 1  ;;  %v521_v48 = vrot.slane %v520_v42, 1  ;;  %v538_v49 = vadd.f32 %v537_v43, %v536_v37 }
  0xc0   : > { %v507_v51 = vrot.slane %v506_v44, 1  ;;  %v527_v53 = vrot.slane %v526_v45, 1  ;;  %v544_v3 = vadd.f32 %v543_v46, %v542_v40 }
  0xc1   : > { %v502_v54 = vadd.f32 %v501_v47, %v500_v41  ;;  %v522_v55 = vadd.f32 %v521_v48, %v520_v42  ;;  %v539_v57 = vrot.slane %v538_v49, 1 }
  0xc2   : > { %v508_v58 = vadd.f32 %v507_v51, %v506_v44  ;;  %v528_v59 = vadd.f32 %v527_v53, %v526_v45  ;;  %v545_v61 = vrot.slane %v544_v3, 1 }
  0xc3   : > { %v509_v62 = vadd.f32 %v502_v54, %v493_v50  ;;  %v529_v63 = vadd.f32 %v522_v55, %v513_v52  ;;  %v540_v0 = vadd.f32 %v539_v57, %v538_v49 }
  0xc4   : > { %v510_v2 = vadd.f32 %v508_v58, %v494_v4  ;;  %v530_v7 = vadd.f32 %v528_v59, %v514_v56  ;;  %v546_v8 = vadd.f32 %v545_v61, %v544_v3 }
  0xc5   : > { %511 = vst [vmem:[%s1359_s13] sm:$0x1] %v509_v62  ;;  %531 = vst [vmem:[%s1363_s18] sm:$0x1] %v529_v63  ;;  %v547_v5 = vadd.f32 %v540_v0, %v533_v60 }
  0xc6   : > { %512 = vst [vmem:[%s1359_s13 + $0x1] sm:$0x1] %v510_v2  ;;  %532 = vst [vmem:[%s1363_s18 + $0x1] sm:$0x1] %v530_v7  ;;  %v548_v9 = vadd.f32 %v546_v8, %v534_v1 }
  0xc7   : > { %549 = vst [vmem:[%s1367_s27] sm:$0x1] %v547_v5 }
  0xc8   : > { %550 = vst [vmem:[%s1367_s27 + $0x1] sm:$0x1] %v548_v9 }
  0xc9 PF: > { %s556_s25 = sand.u32 1, %s1244_s23   ;;  %s1450_s14 = sshll.u32 %s1160_s20, 5 }
  0xca   : > { %s1456_s29 = scalar_lea.hbm %s1595_s3, %s1450_s14  ;;  %s591_s8 = sshll.u32 %s1363_s18, 4  ;;  %s1459_s8 = int_to_ptr.vmem [resolvable:$true] %s591_s8 }
  0xcb   : > { %s1465_s10 = scalar_lea.hbm %s1594_s2, %s1450_s14  ;;  %s1467_s20 = scalar_lea.sflag [#allocation9], %s556_s25 }
  0xcc   : > { %s1001_s23 = scalar_lea.vmem %s1459_s8, 32  ;;  %p1616_p10 = scmp.ne.s32.totalorder %s1604_s5, 0 }
  0xcd   : > { %p1002_p9 = scmp.ne.s32.totalorder %s1459_s8, %s1001_s23  ;;  %s1175_s12 = smov [#allocation8]  }
  0xce   : > { %s1005_s24 = sshll.u32 %s1175_s12, 4  ;;  %s1006_s24 = int_to_ptr.vmem [resolvable:$false] %s1005_s24 }
  0xcf   : > { %p1003_p11 = pnand %p1002_p9, %p1616_p10  ;;  %s1007_s18 = scalar_lea.vmem %s1006_s24, 64 }
  0xd0   : > { %p1008_p3 = scmp.lt.s32.totalorder %s1459_s8, %s1006_s24  ;;  %p1009_p7 = scmp.lt.s32.totalorder %s1007_s18, %s1001_s23 }
  0xd1   : > { %p1004_p1 = pneg %p1003_p11 }
  0xd2   : > { %p1010_p13 = por %p1009_p7, %p1008_p3 }
  0xd4   : > { %p1011_p4 = pnand %p1010_p13, %p1004_p1 }
  0xd6   : > { %1014 = shalt.err (!%p1011_p4)
}
  0xd7   : > { %s1015_s25 = scalar_lea.hbm %s1456_s29, 32  ;;  %s1019_s9 = scalar_lea.hbm %s1595_s3, 64 }
  0xd8   : > { %p1016_p6 = scmp.ne.s32.totalorder %s1456_s29, %s1015_s25  ;;  %p1020_p5 = scmp.lt.u32.totalorder %s1456_s29, %s1595_s3 }
  0xd9   : > { %p1021_p2 = scmp.lt.u32.totalorder %s1019_s9, %s1015_s25  ;;  %p1023_p9 = scmp.lt.u32.totalorder %s1015_s25, %s1456_s29 }
  0xda   : > { %p1017_p12 = pnand %p1016_p6, %p1616_p10 }
  0xdb   : > { %p1022_p8 = por %p1021_p2, %p1020_p5 }
  0xdc   : > { %p1018_p0 = pneg %p1017_p12 }
  0xdd   : > { %p1024_p11 = por %p1023_p9, %p1022_p8 }
  0xdf   : > { %p1025_p1 = pnand %p1024_p11, %p1018_p0 }
  0xe1   : > { %1028 = shalt.err (!%p1025_p1)
}
  0xe2   : > { %s1176_s23 = smov 16   ;;  %s1177_s24 = smov 1  }
  0xe3   : > { %816 = dma.vmem_to_hbm [thread:$0]  (%p1616_p10), %s1459_s8, 32, %s1456_s29, %s1467_s20, %s1176_s23, %s1176_s23, %s1177_s24  }
  0xe4   : > { %s575_s18 = sshll.u32 %s1359_s13, 4  ;;  %s1499_s28 = scalar_lea.hbm %s1596_s4, %s1450_s14  ;;  %s1501_s18 = int_to_ptr.vmem [resolvable:$true] %s575_s18 }
  0xe5   : > { %s607_s9 = sshll.u32 %s1367_s27, 4  ;;  %s1506_s11 = scalar_lea.sflag [#allocation4], %s285_s7  ;;  %s1535_s9 = int_to_ptr.vmem [resolvable:$true] %s607_s9 }
  0xe6   : > { %s1029_s12 = scalar_lea.vmem %s1501_s18, 32  ;;  %s1178_s13 = smov [#allocation7]  }
  0xe7   : > { %p1030_p3 = scmp.ne.s32.totalorder %s1501_s18, %s1029_s12  ;;  %s1033_s29 = sshll.u32 %s1178_s13, 4  ;;  %s1034_s29 = int_to_ptr.vmem [resolvable:$false] %s1033_s29 }
  0xe8   : > { %s1035_s8 = scalar_lea.vmem %s1034_s29, 64  ;;  %p1036_p4 = scmp.lt.s32.totalorder %s1501_s18, %s1034_s29 }
  0xe9   : > { %p1031_p7 = pnand %p1030_p3, %p1616_p10  ;;  %p1037_p6 = scmp.lt.s32.totalorder %s1035_s8, %s1029_s12 }
  0xeb   : > { %p1032_p13 = pneg %p1031_p7  ;;  %p1038_p12 = por %p1037_p6, %p1036_p4 }
  0xed   : > { %p1039_p0 = pnand %p1038_p12, %p1032_p13 }
  0xef   : > { %1042 = shalt.err (!%p1039_p0)
}
  0xf0   : > { %s1043_s7 = scalar_lea.hbm %s1465_s10, 32  ;;  %s1047_s26 = scalar_lea.hbm %s1594_s2, 64 }
  0xf1   : > { %p1044_p5 = scmp.ne.s32.totalorder %s1465_s10, %s1043_s7  ;;  %p1048_p9 = scmp.lt.u32.totalorder %s1465_s10, %s1594_s2 }
  0xf2   : > { %p1049_p11 = scmp.lt.u32.totalorder %s1047_s26, %s1043_s7  ;;  %p1051_p3 = scmp.lt.u32.totalorder %s1043_s7, %s1465_s10 }
  0xf3   : > { %p1045_p2 = pnand %p1044_p5, %p1616_p10 }
  0xf4   : > { %p1050_p1 = por %p1049_p11, %p1048_p9 }
  0xf5   : > { %p1046_p8 = pneg %p1045_p2 }
  0xf6   : > { %p1052_p7 = por %p1051_p3, %p1050_p1 }
  0xf8   : > { %p1053_p13 = pnand %p1052_p7, %p1046_p8 }
  0xfa   : > { %1056 = shalt.err (!%p1053_p13)
}
  0xfb   : > { %815 = dma.vmem_to_hbm [thread:$0]  (%p1616_p10), %s1501_s18, 32, %s1465_s10, %s1506_s11, %s1176_s23, %s1176_s23, %s1177_s24  }
  0xfc   : > { %s1057_s12 = scalar_lea.vmem %s1535_s9, 32  ;;  %s1179_s8 = smov [#allocation10]  }
  0xfd   : > { %p1058_p4 = scmp.ne.s32.totalorder %s1535_s9, %s1057_s12  ;;  %s1061_s7 = sshll.u32 %s1179_s8, 4  ;;  %s1062_s7 = int_to_ptr.vmem [resolvable:$false] %s1061_s7 }
  0xfe   : > { %s1063_s14 = scalar_lea.vmem %s1062_s7, 64  ;;  %p1064_p0 = scmp.lt.s32.totalorder %s1535_s9, %s1062_s7 }
  0xff   : > { %p1059_p6 = pnand %p1058_p4, %p1616_p10  ;;  %p1065_p5 = scmp.lt.s32.totalorder %s1063_s14, %s1057_s12 }
 0x101   : > { %p1060_p12 = pneg %p1059_p6  ;;  %p1066_p2 = por %p1065_p5, %p1064_p0 }
 0x103   : > { %p1067_p8 = pnand %p1066_p2, %p1060_p12 }
 0x105   : > { %1070 = shalt.err (!%p1067_p8)
}
 0x106   : > { %s1071_s27 = scalar_lea.hbm %s1499_s28, 32  ;;  %s1075_s11 = scalar_lea.hbm %s1596_s4, 64 }
 0x107   : > { %p1072_p9 = scmp.ne.s32.totalorder %s1499_s28, %s1071_s27  ;;  %p1076_p3 = scmp.lt.u32.totalorder %s1499_s28, %s1596_s4 }
 0x108   : > { %p1077_p7 = scmp.lt.u32.totalorder %s1075_s11, %s1071_s27  ;;  %p1079_p4 = scmp.lt.u32.totalorder %s1071_s27, %s1499_s28 }
 0x109   : > { %p1073_p11 = pnand %p1072_p9, %p1616_p10 }
 0x10a   : > { %p1078_p13 = por %p1077_p7, %p1076_p3 }
 0x10b   : > { %p1074_p1 = pneg %p1073_p11 }
 0x10c   : > { %p1080_p6 = por %p1079_p4, %p1078_p13 }
 0x10e   : > { %p1081_p12 = pnand %p1080_p6, %p1074_p1 }
 0x110   : > { %1084 = shalt.err (!%p1081_p12)
}
 0x111   : > { %817 = dma.vmem_to_hbm [thread:$0]  (%p1616_p10), %s1535_s9, 32, %s1499_s28, %s1467_s20, %s1176_s23, %s1176_s23, %s1177_s24  }
 0x112 PF: > { %s622_s13 = sand.u32 1, %s1140_s15   ;;  %p1617_p0 = scmp.ne.s32.totalorder %s1605_s6, 0 }
 0x113   : > { %p1618_p5 = scmp.ge.s32.totalorder %s1168_s22, 2  ;;  %s623_s29 = scalar_lea.sflag [#allocation4], %s622_s13 }
 0x115   : > { %p829_p2 = pnand %p1618_p5, %p1617_p0 }
 0x117   : > { %1130 = dma.done.wait (!%p829_p2), %s623_s29, 32  }
 0x118   : > { %1132 = vsyncadd (!%p829_p2), %s623_s29, 4294967264  ;;  %s1619_s5 = sadd.s32 4294967294, %s1168_s22  }
 0x119   : > { %s631_s12 = sand.u32 1, %s1619_s5  }
 0x11a   : > { %s632_s8 = scalar_lea.sflag [#allocation9], %s631_s12 }
 0x11b   : > { %1134 = dma.done.wait (!%p829_p2), %s632_s8, 64  }
 0x11c   : > { %1136 = vsyncadd (!%p829_p2), %s632_s8, 4294967232  ;;  %s27_s22 = sadd.s32 1, %s1168_s22   ;;  %s1620_s6 = sld [smem:[#allocation15_spill]] }
 0x11d   : > { %p24_p10 = scmp.ge.s32.totalorder %s27_s22, 4   ;;  %s1621_s15 = smov %s1144_s16 }
 0x11e   : > { %s1622_s16 = smov %s1148_s17  ;;  %s1623_s17 = smov %s1266_s30 }
 0x11f   : > { %s1624_s18 = smov %s1156_s19  ;;  %s1582_s19 = smov 0  }
 0x120   : > { %s1625_s20 = smov %s1164_s21  ;;  %26 = sbr.rel (!%p24_p10) target bundleno = 11 (0xb), region = 130 }
 0x122   : > { %s1626_s21 = smov %s1620_s6 }
 0x127   :  { %646 = vsyncpa [#allocation3], 1 }
 0x128   :  { %648 = vsyncpa [#allocation3 + $0x1], 1 }
 0x129   :  { %649 = vsyncpa [#allocation6], 1 }
 0x12a   :  { %651 = vsyncpa [#allocation6 + $0x1], 1 }
 0x12b   :  { %652 = vsyncpa [#allocation4], 1 }
 0x12c   :  { %654 = vsyncpa [#allocation4 + $0x1], 1 }
 0x12d   :  { %655 = vsyncpa [#allocation9], 1 }
 0x12e   :  { %657 = vsyncpa [#allocation9 + $0x1], 1 }

</bundles_post_ra>
